<compile_context>
chip_gen: v7x
topology: tpu7x:2x2x1
jax: 0.10.0
libtpu: 0.0.40
codegen_flags: <defaults>
</compile_context>

<pallas_src>
import functools

import jax
import jax.numpy as jnp
from jax import lax
from jax.experimental import pallas as pl
from jax.experimental.pallas import tpu as pltpu


@functools.lru_cache(maxsize=1)
def _tensorcores_per_chip():
    """Best-effort detection: v7x has 2 TensorCores/chip, v5e/v6e have 1."""
    try:
        kind = jax.devices()[0].device_kind.lower()
    except Exception:  # non-TPU / unusual backends -> treat as single core
        return 1
    return 2 if ("v7" in kind or "7x" in kind) else 1


def _make_attention_kernel(heads, dim_head, batch_per_step, n_q, n_k, scale):
    def kernel(dsx_ref, x_ref, wq_ref, wk_ref, wv_ref, wo_ref, bo_ref, o_ref):
        dsx = dsx_ref[...]            # (Bg*Nq, C)
        xx = x_ref[...]               # (Bg*Nk, C)
        bias = bo_ref[...]            # (1, C)

        accs = [None] * batch_per_step

        # heads / batch_per_step are tiny compile-time constants -> unrolled.
        for h in range(heads):
            # Per-head projections over every folded batch row.  Each weight
            # slab starts at lane 0, so no lane-offset slices of computed
            # values feed the MXU.
            qh_all = jnp.dot(dsx, wq_ref[h],
                             preferred_element_type=jnp.float32) * scale   # (Bg*Nq, d)
            kh_all = jnp.dot(xx, wk_ref[h],
                             preferred_element_type=jnp.float32)           # (Bg*Nk, d)
            vh_all = jnp.dot(xx, wv_ref[h],
                             preferred_element_type=jnp.float32)           # (Bg*Nk, d)

            for b in range(batch_per_step):
                qh = qh_all[b * n_q:(b + 1) * n_q]                         # (Nq, d)
                kh = kh_all[b * n_k:(b + 1) * n_k]                         # (Nk, d)
                vh = vh_all[b * n_k:(b + 1) * n_k]                         # (Nk, d)

                # Contract over dim_head directly; no k.T materialization.
                dots = lax.dot_general(
                    qh, kh, (((1,), (1,)), ((), ())),
                    preferred_element_type=jnp.float32)                    # (Nq, Nk)
                dots = dots - jnp.max(dots, axis=-1, keepdims=True)
                p = jnp.exp(dots)
                attn = p / jnp.sum(p, axis=-1, keepdims=True)              # exact softmax
                hv = jnp.dot(attn, vh,
                             preferred_element_type=jnp.float32)           # (Nq, d)

                # Per-head output projection accumulated in place: same MACs
                # as concat + (Nq,inner)@(inner,C), but no head-concat lane
                # relayout on the critical path.
                contrib = jnp.dot(hv, wo_ref[h],
                                  preferred_element_type=jnp.float32)      # (Nq, C)
                accs[b] = contrib if accs[b] is None else accs[b] + contrib

        for b in range(batch_per_step):
            out_b = accs[b] + bias                                         # bias broadcast
            o_ref[b * n_q:(b + 1) * n_q, :] = out_b.astype(o_ref.dtype)

    return kernel


@functools.partial(jax.jit, static_argnames=("heads", "dim_head"))
def attention_pallas(downsample_x, x, wq, wkv, wo, bo, *, heads, dim_head):
    """downsample_x: (B, Nq, C), x: (B, Nk, C).

    wq : (C, heads*dim_head)        == to_q.weight.T
    wkv: (C, 2*heads*dim_head)      == to_kv.weight.T
    wo : (heads*dim_head, C)        == to_out[0].weight.T
    bo : (C,)                       == to_out[0].bias
    """
    B, Nq, C = downsample_x.shape
    _, Nk, _ = x.shape
    inner = heads * dim_head
    scale = float(dim_head) ** -0.5

    # Per-head, lane-0-aligned weight packing (layout plumbing done once by
    # XLA outside the kernel; no weight value is modified).
    wq_h = wq.reshape(C, heads, dim_head).transpose(1, 0, 2)               # (h, C, d)
    wk_h = wkv[:, :inner].reshape(C, heads, dim_head).transpose(1, 0, 2)   # (h, C, d)
    wv_h = wkv[:, inner:].reshape(C, heads, dim_head).transpose(1, 0, 2)   # (h, C, d)
    wo_h = wo.reshape(heads, dim_head, C)                                  # (h, d, C)
    bo2 = bo.reshape(1, C)

    # Fold batch into rows so projections run over B*N rows and refs are 2-D.
    dsx_flat = downsample_x.reshape(B * Nq, C)
    x_flat = x.reshape(B * Nk, C)

    # Grid: one step per TensorCore group.  v7x (2 TCs) -> 2 "parallel" steps
    # with B/2 batches each; single-TC v5e/v6e -> the whole batch in one step
    # (no per-step overhead, fatter projection matmuls).
    n_tc = _tensorcores_per_chip()
    if (n_tc > 1 and B % n_tc == 0
            and (B // n_tc) * Nq % 8 == 0 and (B // n_tc) * Nk % 8 == 0):
        groups = n_tc
    else:
        groups = 1
    bg = B // groups

    kernel = _make_attention_kernel(heads, dim_head, bg, Nq, Nk, scale)

    act_bytes = jnp.dtype(downsample_x.dtype).itemsize
    w_bytes = jnp.dtype(wq.dtype).itemsize
    flops = 2 * B * (Nq * C * inner                      # q projection
                     + 2 * Nk * C * inner                # k and v projections
                     + 2 * heads * Nq * Nk * dim_head    # QK^T and attn@V
                     + Nq * inner * C)                   # output projection
    transcendentals = B * heads * Nq * Nk                # exp
    bytes_accessed = (act_bytes * (2 * B * Nq * C + B * Nk * C)   # dsx, out, x
                      + w_bytes * (4 * C * inner + C))            # weights + bias

    out_flat = pl.pallas_call(
        kernel,
        out_shape=jax.ShapeDtypeStruct((B * Nq, C), downsample_x.dtype),
        grid_spec=pltpu.PrefetchScalarGridSpec(
            num_scalar_prefetch=0,
            grid=(groups,),
            in_specs=[
                pl.BlockSpec((bg * Nq, C), lambda g: (g, 0)),
                pl.BlockSpec((bg * Nk, C), lambda g: (g, 0)),
                pl.BlockSpec((heads, C, dim_head), lambda g: (0, 0, 0)),
                pl.BlockSpec((heads, C, dim_head), lambda g: (0, 0, 0)),
                pl.BlockSpec((heads, C, dim_head), lambda g: (0, 0, 0)),
                pl.BlockSpec((heads, dim_head, C), lambda g: (0, 0, 0)),
                pl.BlockSpec((1, C), lambda g: (0, 0)),
            ],
            out_specs=pl.BlockSpec((bg * Nq, C), lambda g: (g, 0)),
        ),
        compiler_params=pltpu.CompilerParams(
            dimension_semantics=("parallel",)),
        cost_estimate=pl.CostEstimate(
            flops=flops,
            transcendentals=transcendentals,
            bytes_accessed=bytes_accessed),
    )(dsx_flat, x_flat, wq_h, wk_h, wv_h, wo_h, bo2)

    return out_flat.reshape(B, Nq, C)


def attention_ref(downsample_x, x, wq, wkv, wo, bo, *, heads, dim_head):
    """Pure-JAX reference mirroring the PyTorch forward (dropout p=0 == identity)."""
    B, Nq, C = downsample_x.shape
    _, Nk, _ = x.shape
    inner = heads * dim_head
    scale = float(dim_head) ** -0.5

    with jax.default_matmul_precision("highest"):
        q = downsample_x @ wq                                    # (B, Nq, inner)
        kv = x @ wkv                                             # (B, Nk, 2*inner)
        k, v = kv[..., :inner], kv[..., inner:]

        def split_heads(t, n):
            return t.reshape(B, n, heads, dim_head).transpose(0, 2, 1, 3)

        q = split_heads(q, Nq)
        k = split_heads(k, Nk)
        v = split_heads(v, Nk)

        dots = jnp.einsum('bhqd,bhkd->bhqk', q, k) * scale
        attn = jax.nn.softmax(dots, axis=-1)
        out = jnp.einsum('bhqk,bhkd->bhqd', attn, v)
        out = out.transpose(0, 2, 1, 3).reshape(B, Nq, inner)
        return out @ wo + bo


if __name__ == "__main__":
    # Small shapes consistent with the module: C (channels) = 32, heads = 2,
    # dim_head = 16; x is H*W = 64 tokens, downsample_x is H/2*W/2 = 16 tokens.
    B, C, heads, dim_head = 2, 32, 2, 16
    Nk, Nq = 64, 16
    inner = heads * dim_head

    key = jax.random.PRNGKey(0)
    k1, k2, k3, k4, k5, k6 = jax.random.split(key, 6)

    downsample_x = jax.random.normal(k1, (B, Nq, C), dtype=jnp.float32)
    x = jax.random.normal(k2, (B, Nk, C), dtype=jnp.float32)

    # Deterministic synthetic parameters (shapes from the module's __init__).
    wq = jax.random.normal(k3, (C, inner), dtype=jnp.float32) * 0.1
    wkv = jax.random.normal(k4, (C, 2 * inner), dtype=jnp.float32) * 0.1
    wo = jax.random.normal(k5, (inner, C), dtype=jnp.float32) * 0.1
    bo = jax.random.normal(k6, (C,), dtype=jnp.float32) * 0.1

    out = attention_pallas(downsample_x, x, wq, wkv, wo, bo,
                           heads=heads, dim_head=dim_head)
    out = jax.block_until_ready(out)

    ref = attention_ref(downsample_x, x, wq, wkv, wo, bo,
                        heads=heads, dim_head=dim_head)
    assert out.shape == (B, Nq, C)
    # Exact softmax path (no approx reciprocal) -> tight tolerance.
    assert jnp.allclose(out, ref, atol=1e-4, rtol=1e-4), "mismatch vs reference"

    print("KERNEL_OK")
</pallas_src>

<mosaic_0001>
module attributes {stable_mosaic.version = 11 : i64} {
  func.func @kernel(%arg0: i32, %arg1: memref<32x32xf32, #tpu.memory_space<vmem>>, %arg2: memref<128x32xf32, #tpu.memory_space<vmem>>, %arg3: memref<2x32x16xf32, #tpu.memory_space<vmem>>, %arg4: memref<2x32x16xf32, #tpu.memory_space<vmem>>, %arg5: memref<2x32x16xf32, #tpu.memory_space<vmem>>, %arg6: memref<2x16x32xf32, #tpu.memory_space<vmem>>, %arg7: memref<1x32xf32, #tpu.memory_space<vmem>>, %arg8: memref<32x32xf32, #tpu.memory_space<vmem>>) attributes {dimension_semantics = [#tpu.dimension_semantics<parallel>], iteration_bounds = array<i64: 1>, scalar_prefetch = 0 : i64, scratch_operands = 0 : i64, tpu.core_type = #tpu.core_type<tc>, window_params = [{transform_indices = @transform_0, window_bounds = array<i64: 32, 32>}, {transform_indices = @transform_1, window_bounds = array<i64: 128, 32>}, {pipeline_mode = #tpu.pipeline_mode<synchronous>, transform_indices = @transform_2, window_bounds = array<i64: 2, 32, 16>}, {pipeline_mode = #tpu.pipeline_mode<synchronous>, transform_indices = @transform_3, window_bounds = array<i64: 2, 32, 16>}, {pipeline_mode = #tpu.pipeline_mode<synchronous>, transform_indices = @transform_4, window_bounds = array<i64: 2, 32, 16>}, {pipeline_mode = #tpu.pipeline_mode<synchronous>, transform_indices = @transform_5, window_bounds = array<i64: 2, 16, 32>}, {pipeline_mode = #tpu.pipeline_mode<synchronous>, transform_indices = @transform_6, window_bounds = array<i64: 1, 32>}, {transform_indices = @transform_7, window_bounds = array<i64: 32, 32>}]} {
    %c0 = arith.constant 0 : index
    %c0_0 = arith.constant 0 : index
    %0 = vector.load %arg1[%c0, %c0_0] : memref<32x32xf32, #tpu.memory_space<vmem>>, vector<32x32xf32>
    %c0_1 = arith.constant 0 : index
    %c0_2 = arith.constant 0 : index
    %1 = vector.load %arg2[%c0_1, %c0_2] : memref<128x32xf32, #tpu.memory_space<vmem>>, vector<128x32xf32>
    %c0_3 = arith.constant 0 : index
    %c0_4 = arith.constant 0 : index
    %2 = vector.load %arg7[%c0_3, %c0_4] : memref<1x32xf32, #tpu.memory_space<vmem>>, vector<1x32xf32>
    %c0_5 = arith.constant 0 : index
    %c0_6 = arith.constant 0 : index
    %c0_7 = arith.constant 0 : index
    %3 = vector.load %arg3[%c0_5, %c0_6, %c0_7] : memref<2x32x16xf32, #tpu.memory_space<vmem>>, vector<1x32x16xf32>
    %4 = vector.shape_cast %3 : vector<1x32x16xf32> to vector<32x16xf32>
    %cst = arith.constant dense<0.000000e+00> : vector<32x16xf32>
    %5 = tpu.matmul %0, %4, %cst {dimension_numbers = #tpu.dot_dimension_numbers<[1], [0], [0], [1], [0, 0, 1, 1], [], []>} : vector<32x32xf32>, vector<32x16xf32>, vector<32x16xf32> -> vector<32x16xf32>
    %cst_8 = arith.constant 2.500000e-01 : f32
    %6 = vector.broadcast %cst_8 : f32 to vector<32x16xf32>
    %7 = arith.mulf %5, %6 : vector<32x16xf32>
    %c0_9 = arith.constant 0 : index
    %c0_10 = arith.constant 0 : index
    %c0_11 = arith.constant 0 : index
    %8 = vector.load %arg4[%c0_9, %c0_10, %c0_11] : memref<2x32x16xf32, #tpu.memory_space<vmem>>, vector<1x32x16xf32>
    %9 = vector.shape_cast %8 : vector<1x32x16xf32> to vector<32x16xf32>
    %cst_12 = arith.constant dense<0.000000e+00> : vector<128x16xf32>
    %10 = tpu.matmul %1, %9, %cst_12 {dimension_numbers = #tpu.dot_dimension_numbers<[1], [0], [0], [1], [0, 0, 1, 1], [], []>} : vector<128x32xf32>, vector<32x16xf32>, vector<128x16xf32> -> vector<128x16xf32>
    %c0_13 = arith.constant 0 : index
    %c0_14 = arith.constant 0 : index
    %c0_15 = arith.constant 0 : index
    %11 = vector.load %arg5[%c0_13, %c0_14, %c0_15] : memref<2x32x16xf32, #tpu.memory_space<vmem>>, vector<1x32x16xf32>
    %12 = vector.shape_cast %11 : vector<1x32x16xf32> to vector<32x16xf32>
    %cst_16 = arith.constant dense<0.000000e+00> : vector<128x16xf32>
    %13 = tpu.matmul %1, %12, %cst_16 {dimension_numbers = #tpu.dot_dimension_numbers<[1], [0], [0], [1], [0, 0, 1, 1], [], []>} : vector<128x32xf32>, vector<32x16xf32>, vector<128x16xf32> -> vector<128x16xf32>
    %14 = vector.extract_strided_slice %7 {offsets = [0, 0], sizes = [16, 16], strides = [1, 1]} : vector<32x16xf32> to vector<16x16xf32>
    %15 = vector.extract_strided_slice %10 {offsets = [0, 0], sizes = [64, 16], strides = [1, 1]} : vector<128x16xf32> to vector<64x16xf32>
    %16 = vector.extract_strided_slice %13 {offsets = [0, 0], sizes = [64, 16], strides = [1, 1]} : vector<128x16xf32> to vector<64x16xf32>
    %cst_17 = arith.constant dense<0.000000e+00> : vector<16x64xf32>
    %17 = tpu.matmul %14, %15, %cst_17 {dimension_numbers = #tpu.dot_dimension_numbers<[1], [1], [0], [0], [0, 0, 1, 0], [], []>} : vector<16x16xf32>, vector<64x16xf32>, vector<16x64xf32> -> vector<16x64xf32>
    %cst_18 = arith.constant dense<0xFF800000> : vector<16xf32>
    %18 = vector.multi_reduction <maximumf>, %17, %cst_18 [1] : vector<16x64xf32> to vector<16xf32>
    %19 = vector.shape_cast %18 : vector<16xf32> to vector<16x1xf32>
    %20 = vector.broadcast %19 : vector<16x1xf32> to vector<16x64xf32>
    %21 = arith.subf %17, %20 : vector<16x64xf32>
    %22 = math.exp %21 : vector<16x64xf32>
    %cst_19 = arith.constant dense<0.000000e+00> : vector<16xf32>
    %23 = vector.multi_reduction <add>, %22, %cst_19 [1] : vector<16x64xf32> to vector<16xf32>
    %24 = vector.shape_cast %23 : vector<16xf32> to vector<16x1xf32>
    %25 = vector.broadcast %24 : vector<16x1xf32> to vector<16x64xf32>
    %26 = arith.divf %22, %25 : vector<16x64xf32>
    %cst_20 = arith.constant dense<0.000000e+00> : vector<16x16xf32>
    %27 = tpu.matmul %26, %16, %cst_20 {dimension_numbers = #tpu.dot_dimension_numbers<[1], [0], [0], [1], [0, 0, 1, 1], [], []>} : vector<16x64xf32>, vector<64x16xf32>, vector<16x16xf32> -> vector<16x16xf32>
    %c0_21 = arith.constant 0 : index
    %c0_22 = arith.constant 0 : index
    %c0_23 = arith.constant 0 : index
    %28 = vector.load %arg6[%c0_21, %c0_22, %c0_23] : memref<2x16x32xf32, #tpu.memory_space<vmem>>, vector<1x16x32xf32>
    %29 = vector.shape_cast %28 : vector<1x16x32xf32> to vector<16x32xf32>
    %cst_24 = arith.constant dense<0.000000e+00> : vector<16x32xf32>
    %30 = tpu.matmul %27, %29, %cst_24 {dimension_numbers = #tpu.dot_dimension_numbers<[1], [0], [0], [1], [0, 0, 1, 1], [], []>} : vector<16x16xf32>, vector<16x32xf32>, vector<16x32xf32> -> vector<16x32xf32>
    %31 = vector.extract_strided_slice %7 {offsets = [16, 0], sizes = [16, 16], strides = [1, 1]} : vector<32x16xf32> to vector<16x16xf32>
    %32 = vector.extract_strided_slice %10 {offsets = [64, 0], sizes = [64, 16], strides = [1, 1]} : vector<128x16xf32> to vector<64x16xf32>
    %33 = vector.extract_strided_slice %13 {offsets = [64, 0], sizes = [64, 16], strides = [1, 1]} : vector<128x16xf32> to vector<64x16xf32>
    %cst_25 = arith.constant dense<0.000000e+00> : vector<16x64xf32>
    %34 = tpu.matmul %31, %32, %cst_25 {dimension_numbers = #tpu.dot_dimension_numbers<[1], [1], [0], [0], [0, 0, 1, 0], [], []>} : vector<16x16xf32>, vector<64x16xf32>, vector<16x64xf32> -> vector<16x64xf32>
    %cst_26 = arith.constant dense<0xFF800000> : vector<16xf32>
    %35 = vector.multi_reduction <maximumf>, %34, %cst_26 [1] : vector<16x64xf32> to vector<16xf32>
    %36 = vector.shape_cast %35 : vector<16xf32> to vector<16x1xf32>
    %37 = vector.broadcast %36 : vector<16x1xf32> to vector<16x64xf32>
    %38 = arith.subf %34, %37 : vector<16x64xf32>
    %39 = math.exp %38 : vector<16x64xf32>
    %cst_27 = arith.constant dense<0.000000e+00> : vector<16xf32>
    %40 = vector.multi_reduction <add>, %39, %cst_27 [1] : vector<16x64xf32> to vector<16xf32>
    %41 = vector.shape_cast %40 : vector<16xf32> to vector<16x1xf32>
    %42 = vector.broadcast %41 : vector<16x1xf32> to vector<16x64xf32>
    %43 = arith.divf %39, %42 : vector<16x64xf32>
    %cst_28 = arith.constant dense<0.000000e+00> : vector<16x16xf32>
    %44 = tpu.matmul %43, %33, %cst_28 {dimension_numbers = #tpu.dot_dimension_numbers<[1], [0], [0], [1], [0, 0, 1, 1], [], []>} : vector<16x64xf32>, vector<64x16xf32>, vector<16x16xf32> -> vector<16x16xf32>
    %c0_29 = arith.constant 0 : index
    %c0_30 = arith.constant 0 : index
    %c0_31 = arith.constant 0 : index
    %45 = vector.load %arg6[%c0_29, %c0_30, %c0_31] : memref<2x16x32xf32, #tpu.memory_space<vmem>>, vector<1x16x32xf32>
    %46 = vector.shape_cast %45 : vector<1x16x32xf32> to vector<16x32xf32>
    %cst_32 = arith.constant dense<0.000000e+00> : vector<16x32xf32>
    %47 = tpu.matmul %44, %46, %cst_32 {dimension_numbers = #tpu.dot_dimension_numbers<[1], [0], [0], [1], [0, 0, 1, 1], [], []>} : vector<16x16xf32>, vector<16x32xf32>, vector<16x32xf32> -> vector<16x32xf32>
    %c1 = arith.constant 1 : index
    %c0_33 = arith.constant 0 : index
    %c0_34 = arith.constant 0 : index
    %48 = vector.load %arg3[%c1, %c0_33, %c0_34] : memref<2x32x16xf32, #tpu.memory_space<vmem>>, vector<1x32x16xf32>
    %49 = vector.shape_cast %48 : vector<1x32x16xf32> to vector<32x16xf32>
    %cst_35 = arith.constant dense<0.000000e+00> : vector<32x16xf32>
    %50 = tpu.matmul %0, %49, %cst_35 {dimension_numbers = #tpu.dot_dimension_numbers<[1], [0], [0], [1], [0, 0, 1, 1], [], []>} : vector<32x32xf32>, vector<32x16xf32>, vector<32x16xf32> -> vector<32x16xf32>
    %cst_36 = arith.constant 2.500000e-01 : f32
    %51 = vector.broadcast %cst_36 : f32 to vector<32x16xf32>
    %52 = arith.mulf %50, %51 : vector<32x16xf32>
    %c1_37 = arith.constant 1 : index
    %c0_38 = arith.constant 0 : index
    %c0_39 = arith.constant 0 : index
    %53 = vector.load %arg4[%c1_37, %c0_38, %c0_39] : memref<2x32x16xf32, #tpu.memory_space<vmem>>, vector<1x32x16xf32>
    %54 = vector.shape_cast %53 : vector<1x32x16xf32> to vector<32x16xf32>
    %cst_40 = arith.constant dense<0.000000e+00> : vector<128x16xf32>
    %55 = tpu.matmul %1, %54, %cst_40 {dimension_numbers = #tpu.dot_dimension_numbers<[1], [0], [0], [1], [0, 0, 1, 1], [], []>} : vector<128x32xf32>, vector<32x16xf32>, vector<128x16xf32> -> vector<128x16xf32>
    %c1_41 = arith.constant 1 : index
    %c0_42 = arith.constant 0 : index
    %c0_43 = arith.constant 0 : index
    %56 = vector.load %arg5[%c1_41, %c0_42, %c0_43] : memref<2x32x16xf32, #tpu.memory_space<vmem>>, vector<1x32x16xf32>
    %57 = vector.shape_cast %56 : vector<1x32x16xf32> to vector<32x16xf32>
    %cst_44 = arith.constant dense<0.000000e+00> : vector<128x16xf32>
    %58 = tpu.matmul %1, %57, %cst_44 {dimension_numbers = #tpu.dot_dimension_numbers<[1], [0], [0], [1], [0, 0, 1, 1], [], []>} : vector<128x32xf32>, vector<32x16xf32>, vector<128x16xf32> -> vector<128x16xf32>
    %59 = vector.extract_strided_slice %52 {offsets = [0, 0], sizes = [16, 16], strides = [1, 1]} : vector<32x16xf32> to vector<16x16xf32>
    %60 = vector.extract_strided_slice %55 {offsets = [0, 0], sizes = [64, 16], strides = [1, 1]} : vector<128x16xf32> to vector<64x16xf32>
    %61 = vector.extract_strided_slice %58 {offsets = [0, 0], sizes = [64, 16], strides = [1, 1]} : vector<128x16xf32> to vector<64x16xf32>
    %cst_45 = arith.constant dense<0.000000e+00> : vector<16x64xf32>
    %62 = tpu.matmul %59, %60, %cst_45 {dimension_numbers = #tpu.dot_dimension_numbers<[1], [1], [0], [0], [0, 0, 1, 0], [], []>} : vector<16x16xf32>, vector<64x16xf32>, vector<16x64xf32> -> vector<16x64xf32>
    %cst_46 = arith.constant dense<0xFF800000> : vector<16xf32>
    %63 = vector.multi_reduction <maximumf>, %62, %cst_46 [1] : vector<16x64xf32> to vector<16xf32>
    %64 = vector.shape_cast %63 : vector<16xf32> to vector<16x1xf32>
    %65 = vector.broadcast %64 : vector<16x1xf32> to vector<16x64xf32>
    %66 = arith.subf %62, %65 : vector<16x64xf32>
    %67 = math.exp %66 : vector<16x64xf32>
    %cst_47 = arith.constant dense<0.000000e+00> : vector<16xf32>
    %68 = vector.multi_reduction <add>, %67, %cst_47 [1] : vector<16x64xf32> to vector<16xf32>
    %69 = vector.shape_cast %68 : vector<16xf32> to vector<16x1xf32>
    %70 = vector.broadcast %69 : vector<16x1xf32> to vector<16x64xf32>
    %71 = arith.divf %67, %70 : vector<16x64xf32>
    %cst_48 = arith.constant dense<0.000000e+00> : vector<16x16xf32>
    %72 = tpu.matmul %71, %61, %cst_48 {dimension_numbers = #tpu.dot_dimension_numbers<[1], [0], [0], [1], [0, 0, 1, 1], [], []>} : vector<16x64xf32>, vector<64x16xf32>, vector<16x16xf32> -> vector<16x16xf32>
    %c1_49 = arith.constant 1 : index
    %c0_50 = arith.constant 0 : index
    %c0_51 = arith.constant 0 : index
    %73 = vector.load %arg6[%c1_49, %c0_50, %c0_51] : memref<2x16x32xf32, #tpu.memory_space<vmem>>, vector<1x16x32xf32>
    %74 = vector.shape_cast %73 : vector<1x16x32xf32> to vector<16x32xf32>
    %cst_52 = arith.constant dense<0.000000e+00> : vector<16x32xf32>
    %75 = tpu.matmul %72, %74, %cst_52 {dimension_numbers = #tpu.dot_dimension_numbers<[1], [0], [0], [1], [0, 0, 1, 1], [], []>} : vector<16x16xf32>, vector<16x32xf32>, vector<16x32xf32> -> vector<16x32xf32>
    %76 = arith.addf %30, %75 : vector<16x32xf32>
    %77 = vector.extract_strided_slice %52 {offsets = [16, 0], sizes = [16, 16], strides = [1, 1]} : vector<32x16xf32> to vector<16x16xf32>
    %78 = vector.extract_strided_slice %55 {offsets = [64, 0], sizes = [64, 16], strides = [1, 1]} : vector<128x16xf32> to vector<64x16xf32>
    %79 = vector.extract_strided_slice %58 {offsets = [64, 0], sizes = [64, 16], strides = [1, 1]} : vector<128x16xf32> to vector<64x16xf32>
    %cst_53 = arith.constant dense<0.000000e+00> : vector<16x64xf32>
    %80 = tpu.matmul %77, %78, %cst_53 {dimension_numbers = #tpu.dot_dimension_numbers<[1], [1], [0], [0], [0, 0, 1, 0], [], []>} : vector<16x16xf32>, vector<64x16xf32>, vector<16x64xf32> -> vector<16x64xf32>
    %cst_54 = arith.constant dense<0xFF800000> : vector<16xf32>
    %81 = vector.multi_reduction <maximumf>, %80, %cst_54 [1] : vector<16x64xf32> to vector<16xf32>
    %82 = vector.shape_cast %81 : vector<16xf32> to vector<16x1xf32>
    %83 = vector.broadcast %82 : vector<16x1xf32> to vector<16x64xf32>
    %84 = arith.subf %80, %83 : vector<16x64xf32>
    %85 = math.exp %84 : vector<16x64xf32>
    %cst_55 = arith.constant dense<0.000000e+00> : vector<16xf32>
    %86 = vector.multi_reduction <add>, %85, %cst_55 [1] : vector<16x64xf32> to vector<16xf32>
    %87 = vector.shape_cast %86 : vector<16xf32> to vector<16x1xf32>
    %88 = vector.broadcast %87 : vector<16x1xf32> to vector<16x64xf32>
    %89 = arith.divf %85, %88 : vector<16x64xf32>
    %cst_56 = arith.constant dense<0.000000e+00> : vector<16x16xf32>
    %90 = tpu.matmul %89, %79, %cst_56 {dimension_numbers = #tpu.dot_dimension_numbers<[1], [0], [0], [1], [0, 0, 1, 1], [], []>} : vector<16x64xf32>, vector<64x16xf32>, vector<16x16xf32> -> vector<16x16xf32>
    %c1_57 = arith.constant 1 : index
    %c0_58 = arith.constant 0 : index
    %c0_59 = arith.constant 0 : index
    %91 = vector.load %arg6[%c1_57, %c0_58, %c0_59] : memref<2x16x32xf32, #tpu.memory_space<vmem>>, vector<1x16x32xf32>
    %92 = vector.shape_cast %91 : vector<1x16x32xf32> to vector<16x32xf32>
    %cst_60 = arith.constant dense<0.000000e+00> : vector<16x32xf32>
    %93 = tpu.matmul %90, %92, %cst_60 {dimension_numbers = #tpu.dot_dimension_numbers<[1], [0], [0], [1], [0, 0, 1, 1], [], []>} : vector<16x16xf32>, vector<16x32xf32>, vector<16x32xf32> -> vector<16x32xf32>
    %94 = arith.addf %47, %93 : vector<16x32xf32>
    %95 = vector.broadcast %2 : vector<1x32xf32> to vector<16x32xf32>
    %96 = arith.addf %76, %95 : vector<16x32xf32>
    %c0_61 = arith.constant 0 : index
    %c0_62 = arith.constant 0 : index
    %97 = vector.load %arg8[%c0_61, %c0_62] : memref<32x32xf32, #tpu.memory_space<vmem>>, vector<16x32xf32>
    tpu.vector_store %arg8[%c0_61, %c0_62], %96 {strides = array<i32>} : memref<32x32xf32, #tpu.memory_space<vmem>>, vector<16x32xf32>,
    %98 = vector.broadcast %2 : vector<1x32xf32> to vector<16x32xf32>
    %99 = arith.addf %94, %98 : vector<16x32xf32>
    %c16 = arith.constant 16 : index
    %c0_63 = arith.constant 0 : index
    %100 = vector.load %arg8[%c16, %c0_63] : memref<32x32xf32, #tpu.memory_space<vmem>>, vector<16x32xf32>
    tpu.vector_store %arg8[%c16, %c0_63], %99 {strides = array<i32>} : memref<32x32xf32, #tpu.memory_space<vmem>>, vector<16x32xf32>,
    return
  }
  func.func @transform_0(%arg0: i32) -> (i32, i32) {
    %c0_i32 = arith.constant 0 : i32
    %c0_i32_0 = arith.constant 0 : i32
    return %arg0, %c0_i32 : i32, i32
  }
  func.func @transform_1(%arg0: i32) -> (i32, i32) {
    %c0_i32 = arith.constant 0 : i32
    %c0_i32_0 = arith.constant 0 : i32
    return %arg0, %c0_i32 : i32, i32
  }
  func.func @transform_2(%arg0: i32) -> (i32, i32, i32) {
    %c0_i32 = arith.constant 0 : i32
    %c0_i32_0 = arith.constant 0 : i32
    %c0_i32_1 = arith.constant 0 : i32
    %c0_i32_2 = arith.constant 0 : i32
    return %c0_i32, %c0_i32_0, %c0_i32_1 : i32, i32, i32
  }
  func.func @transform_3(%arg0: i32) -> (i32, i32, i32) {
    %c0_i32 = arith.constant 0 : i32
    %c0_i32_0 = arith.constant 0 : i32
    %c0_i32_1 = arith.constant 0 : i32
    %c0_i32_2 = arith.constant 0 : i32
    return %c0_i32, %c0_i32_0, %c0_i32_1 : i32, i32, i32
  }
  func.func @transform_4(%arg0: i32) -> (i32, i32, i32) {
    %c0_i32 = arith.constant 0 : i32
    %c0_i32_0 = arith.constant 0 : i32
    %c0_i32_1 = arith.constant 0 : i32
    %c0_i32_2 = arith.constant 0 : i32
    return %c0_i32, %c0_i32_0, %c0_i32_1 : i32, i32, i32
  }
  func.func @transform_5(%arg0: i32) -> (i32, i32, i32) {
    %c0_i32 = arith.constant 0 : i32
    %c0_i32_0 = arith.constant 0 : i32
    %c0_i32_1 = arith.constant 0 : i32
    %c0_i32_2 = arith.constant 0 : i32
    return %c0_i32, %c0_i32_0, %c0_i32_1 : i32, i32, i32
  }
  func.func @transform_6(%arg0: i32) -> (i32, i32) {
    %c0_i32 = arith.constant 0 : i32
    %c0_i32_0 = arith.constant 0 : i32
    %c0_i32_1 = arith.constant 0 : i32
    return %c0_i32, %c0_i32_0 : i32, i32
  }
  func.func @transform_7(%arg0: i32) -> (i32, i32) {
    %c0_i32 = arith.constant 0 : i32
    %c0_i32_0 = arith.constant 0 : i32
    return %arg0, %c0_i32 : i32, i32
  }
}

</mosaic_0001>

<bundles_post_ra>
// kernel: attention_pallas.1
= control target key start
LH: loop header
LB: loop body
LE: loop exit
PB: predicated region body
PF: predicated region fallthrough
CT: control target
= control target key end

     0   :  { %vm52_vm0 = vcmask 261120   ;;  %s3585_s0 = inlined_call_operand.vmem [shape: f32[32,32], index: 0, kind: input, shape index: {}]   ;;  %s3586_s1 = inlined_call_operand.vmem [shape: f32[128,32], index: 1, kind: input, shape index: {}]   ;;  %s3587_s2 = inlined_call_operand.vmem [shape: f32[2,32,16], index: 2, kind: input, shape index: {}]   ;;  %s3588_s3 = inlined_call_operand.vmem [shape: f32[2,32,16], index: 3, kind: input, shape index: {}]   ;;  %s3589_s4 = inlined_call_operand.vmem [shape: f32[2,32,16], index: 4, kind: input, shape index: {}]   ;;  %s3590_s5 = inlined_call_operand.vmem [shape: f32[2,16,32], index: 5, kind: input, shape index: {}]   ;;  %s3591_s6 = inlined_call_operand.vmem [shape: f32[1,32], index: 6, kind: input, shape index: {}]   ;;  %s3592_s7 = inlined_call_operand.hbm [shape: f32[32,32], index: 7, kind: output, shape index: {}]  }
   0x1   :  { %v154_v0 = vld [vmem:[%s3588_s3] sm:$0xff]  ;;  %v155_v1 = vld [vmem:[%s3588_s3 + $0x8] sm:$0xff]  ;;  %v156_v2 = vld [vmem:[%s3588_s3 + $0x10] sm:$0xff] }
   0x2   :  { %v2766_v3 = vpack.c.bf16 %v155_v1, %v154_v0  ;;  %v157_v4 = vld [vmem:[%s3588_s3 + $0x18] sm:$0xff]  ;;  %v3103_v5 = vld [vmem:[%s3586_s1] sm:$0xff]  ;;  %v49_v8 = vld [vmem:[%s3587_s2 + $0x8] sm:$0xff] }
   0x3   :  { %v2770_v6 = vpack.c.bf16 %v157_v4, %v156_v2  ;;  %2444 = vmatprep.mubr.msk.f32.mxu1 %vm52_vm0, %v3103_v5  ;;  %v48_v7 = vld [vmem:[%s3587_s2] sm:$0xff]  ;;  %v50_v9 = vld [vmem:[%s3587_s2 + $0x10] sm:$0xff]  ;;  %v51_v11 = vld [vmem:[%s3587_s2 + $0x18] sm:$0xff] }
   0x4   :  { %2767 = vmatprep.subr.bf16.mxu1 %v2766_v3  ;;  %v2758_v10 = vpack.c.bf16 %v49_v8, %v48_v7  ;;  %v3122_v12 = vld [vmem:[%s3585_s0] sm:$0xff]  ;;  %v2762_v13 = vpack.c.bf16 %v51_v11, %v50_v9  ;;  %v3129_v14 = vld [vmem:[%s3586_s1 + $0x8] sm:$0xff]  ;;  %v3134_v15 = vld [vmem:[%s3586_s1 + $0x10] sm:$0xff] }
   0x5   :  { %2769 = vmatpush3.bf16.msra.mxu1 %v2766_v3  ;;  %2430 = vmatprep.mubr.msk.f32.mxu0 %vm52_vm0, %v3122_v12 }
   0x6   :  { %2771 = vmatprep.subr.bf16.mxu1 %v2770_v6  ;;  %2759 = vmatprep.subr.bf16.mxu0 %v2758_v10 }
   0x7   :  { %2761 = vmatpush3.bf16.msra.mxu0 %v2758_v10 }
   0x8   :  { %2763 = vmatprep.subr.bf16.mxu0 %v2762_v13 }
   0x9   :  { %2773 = vmatpush3.bf16.msra.mxu1 %v2770_v6 }
   0xa   :  { %12 = vsyncpa [#allocation3], 0  ;;  %v3143_v16 = vld [vmem:[%s3586_s1 + $0x18] sm:$0xff]  ;;  %v3148_v17 = vld [vmem:[%s3585_s0 + $0x8] sm:$0xff]  ;;  %vm500_vm1 = vcmask 130048   ;;  %vm606_vm3 = vcmask 523264  }
   0xb   :  { %2765 = vmatpush3.bf16.msra.mxu0 %v2762_v13  ;;  %v3153_v18 = vld [vmem:[%s3586_s1 + $0x20] sm:$0xff]  ;;  %v3158_v19 = vld [vmem:[%s3585_s0 + $0x10] sm:$0xff]  ;;  %v3169_v20 = vld [vmem:[%s3586_s1 + $0x28] sm:$0xff] }
   0xc   :  { %2445 = vmatmul.mubr.msk.f32.vlgmr.msra.gmra.mrb[0].mxu1 %vm52_vm0, %v3129_v14  ;;  %v3176_v21 = vld [vmem:[%s3585_s0 + $0x18] sm:$0xff]  ;;  %v3181_v22 = vld [vmem:[%s3586_s1 + $0x30] sm:$0xff]  ;;  %v3199_v24 = vld [vmem:[%s3586_s1 + $0x40] sm:$0xff] }
   0xd   :  { %2447 = vmatprep.mubr.msk.f32.mxu1 %vm52_vm0, %v3134_v15  ;;  %v3192_v23 = vld [vmem:[%s3586_s1 + $0x38] sm:$0xff]  ;;  %v3208_v25 = vld [vmem:[%s3586_s1 + $0x48] sm:$0xff]  ;;  %v3213_v26 = vld [vmem:[%s3586_s1 + $0x50] sm:$0xff] }
   0xe   :  { %2431 = vmatmul.mubr.msk.f32.vlgmr.msra.gmra.mrb[0].mxu0 %vm52_vm0, %v3148_v17  ;;  %v3222_v27 = vld [vmem:[%s3586_s1 + $0x58] sm:$0xff]  ;;  %v3227_v28 = vld [vmem:[%s3586_s1 + $0x60] sm:$0xff]  ;;  %v3236_v29 = vld [vmem:[%s3586_s1 + $0x68] sm:$0xff] }
   0xf   :  { %2433 = vmatprep.mubr.msk.f32.mxu0 %vm52_vm0, %v3158_v19  ;;  %v3241_v30 = vld [vmem:[%s3586_s1 + $0x70] sm:$0xff]  ;;  %v3250_v31 = vld [vmem:[%s3586_s1 + $0x78] sm:$0xff]  ;;  %vm3256_vm2 = vmpackc.low %vm500_vm1, %vm500_vm1 }
  0x10   :  { %2448 = vmatmul.mubr.msk.f32.gmra.mrb[2].mxu1 %vm52_vm0, %v3143_v16  ;;  %v351_v1 = vld [vmem:[%s3589_s4] sm:$0xff]  ;;  %v352_v2 = vld [vmem:[%s3589_s4 + $0x8] sm:$0xff]  ;;  %v353_v3 = vld [vmem:[%s3589_s4 + $0x10] sm:$0xff] }
  0x11   :  { %2450 = vmatprep.mubr.msk.f32.mxu1 %vm52_vm0, %v3153_v18  ;;  %v2774_v4 = vpack.c.bf16 %v352_v2, %v351_v1  ;;  %v354_v6 = vld [vmem:[%s3589_s4 + $0x18] sm:$0xff] }
  0x12   :  { %2434 = vmatmul.mubr.msk.f32.gmra.mrb[2].mxu0 %vm52_vm0, %v3176_v21  ;;  %v2778_v7 = vpack.c.bf16 %v354_v6, %v353_v3 }
  0x13   :  { %2476 = vmatprep.mubr.msk.f32.mxu0 %vm52_vm0, %v3103_v5  ;;  %2775 = vmatprep.subr.bf16.mxu0 %v2774_v4 }
  0x14   :  { %2451 = vmatmul.mubr.msk.f32.gmra.mrb[4].mxu1 %vm52_vm0, %v3169_v20  ;;  %2777 = vmatpush3.bf16.msra.mxu0 %v2774_v4 }
  0x15   :  { %2453 = vmatprep.mubr.msk.f32.mxu1 %vm52_vm0, %v3181_v22  ;;  %2779 = vmatprep.subr.bf16.mxu0 %v2778_v7 }
  0x18   :  { %2454 = vmatmul.mubr.msk.f32.gmra.mrb[6].mxu1 %vm52_vm0, %v3192_v23  ;;  %2781 = vmatpush3.bf16.msra.mxu0 %v2778_v7 }
  0x19   :  { %2456 = vmatprep.mubr.msk.f32.mxu1 %vm52_vm0, %v3199_v24 }
  0x1b   :  { %2477 = vmatmul.mubr.msk.f32.vlgmr.msra.gmra.mrb[4].mxu0 %vm52_vm0, %v3129_v14 }
  0x1c   :  { %2457 = vmatmul.mubr.msk.f32.gmra.mrb[8].mxu1 %vm52_vm0, %v3208_v25  ;;  %2479 = vmatprep.mubr.msk.f32.mxu0 %vm52_vm0, %v3134_v15 }
  0x1d   :  { %2459 = vmatprep.mubr.msk.f32.mxu1 %vm52_vm0, %v3213_v26 }
  0x1f   :  { %2480 = vmatmul.mubr.msk.f32.gmra.mrb[6].mxu0 %vm52_vm0, %v3143_v16 }
  0x20   :  { %2460 = vmatmul.mubr.msk.f32.gmra.mrb[10].mxu1 %vm52_vm0, %v3222_v27  ;;  %2482 = vmatprep.mubr.msk.f32.mxu0 %vm52_vm0, %v3153_v18 }
  0x21   :  { %2462 = vmatprep.mubr.msk.f32.mxu1 %vm52_vm0, %v3227_v28 }
  0x23   :  { %2483 = vmatmul.mubr.msk.f32.gmra.mrb[8].mxu0 %vm52_vm0, %v3169_v20 }
  0x24   :  { %2463 = vmatmul.mubr.msk.f32.gmra.mrb[12].mxu1 %vm52_vm0, %v3236_v29  ;;  %2485 = vmatprep.mubr.msk.f32.mxu0 %vm52_vm0, %v3181_v22 }
  0x25   :  { %2465 = vmatprep.mubr.msk.f32.mxu1 %vm52_vm0, %v3241_v30 }
  0x27   :  { %2486 = vmatmul.mubr.msk.f32.gmra.mrb[10].mxu0 %vm52_vm0, %v3192_v23 }
  0x28   :  { %2466 = vmatmul.mubr.msk.f32.gmra.mrb[14].mxu1 %vm52_vm0, %v3250_v31  ;;  %2488 = vmatprep.mubr.msk.f32.mxu0 %vm52_vm0, %v3199_v24 }
  0x2b   :  { %2489 = vmatmul.mubr.msk.f32.gmra.mrb[12].mxu0 %vm52_vm0, %v3208_v25 }
  0x2c   :  { %2491 = vmatprep.mubr.msk.f32.mxu0 %vm52_vm0, %v3213_v26 }
  0x2f   :  { %2492 = vmatmul.mubr.msk.f32.gmra.mrb[14].mxu0 %vm52_vm0, %v3222_v27 }
  0x30   :  { %2494 = vmatprep.mubr.msk.f32.mxu0 %vm52_vm0, %v3227_v28 }
  0x33   :  { %2495 = vmatmul.mubr.msk.f32.gmra.mrb[16].mxu0 %vm52_vm0, %v3236_v29 }
  0x34   :  { %2497 = vmatprep.mubr.msk.f32.mxu0 %vm52_vm0, %v3241_v30 }
  0x37   :  { %2498 = vmatmul.mubr.msk.f32.gmra.mrb[18].mxu0 %vm52_vm0, %v3250_v31 }
  0xdf   :  { %v2446_v32 = vpop.f32.mrb[0].mxu1 }
  0xe0   :  { %v272_v33 = vpop.f32.mrb[1].mxu1 }
  0xe1   :  { %v2782_v35 = vpack.c.bf16 %v2446_v32, %v272_v33  ;;  %v2432_v37 = vpop.f32.mrb[0].mxu0 }
  0xe2   :  { %v131_v39 = vpop.f32.mrb[1].mxu0  ;;  %v151_v62 = vmul.f32 0.25, %v2432_v37 }
  0xe3   :  { %2784 = vmatprep.subr.msk.bf16.mxu1 %vm3256_vm2, %v2782_v35  ;;  %v2449_v36 = vpop.f32.mrb[2].mxu1  ;;  %v150_v41 = vmul.f32 0.25, %v131_v39 }
  0xe4   :  { %2787 = vmatpush3.bf16.xpose.msk.msra.mxu1 %vm3256_vm2, %v2782_v35  ;;  %v282_v38 = vpop.f32.mrb[3].mxu1 }
  0xe5   :  { %v2788_v40 = vpack.c.bf16 %v2449_v36, %v282_v38  ;;  %2516 = vmatprep.mubr.msk.f32.mxu1 %vm500_vm1, %v150_v41  ;;  %v2435_v43 = vpop.f32.mrb[2].mxu0 }
  0xe6   :  { %v141_v45 = vpop.f32.mrb[3].mxu0  ;;  %v153_v0 = vmul.f32 0.25, %v2435_v43 }
  0xe7   :  { %2790 = vmatprep.subr.msk.bf16.mxu1 %vm3256_vm2, %v2788_v40  ;;  %v2452_v42 = vpop.f32.mrb[4].mxu1  ;;  %v152_v63 = vmul.f32 0.25, %v141_v45 }
  0xe8   :  { %v292_v44 = vpop.f32.mrb[5].mxu1 }
  0xe9   :  { %v2794_v46 = vpack.c.bf16 %v2452_v42, %v292_v44 }
  0xeb   :  { %v2455_v47 = vpop.f32.mrb[6].mxu1 }
  0xec   :  { %2793 = vmatpush3.bf16.xpose.msk.msra.mxu1 %vm3256_vm2, %v2788_v40  ;;  %v302_v48 = vpop.f32.mrb[7].mxu1 }
  0xed   :  { %2796 = vmatprep.subr.msk.bf16.mxu1 %vm3256_vm2, %v2794_v46  ;;  %v2800_v49 = vpack.c.bf16 %v2455_v47, %v302_v48 }
  0xee   :  { %v2478_v36 = vpop.f32.mrb[4].mxu0 }
  0xef   :  { %v2458_v50 = vpop.f32.mrb[8].mxu1  ;;  %v421_v37 = vpop.f32.mrb[5].mxu0 }
  0xf0   :  { %v312_v51 = vpop.f32.mrb[9].mxu1  ;;  %v2806_v38 = vpack.c.bf16 %v2478_v36, %v421_v37 }
  0xf1   :  { %v2822_v52 = vpack.c.bf16 %v2458_v50, %v312_v51 }
  0xf2   :  { %2807 = vmatprep.subr.bf16.mxu0 %v2806_v38 }
  0xf3   :  { %v2461_v53 = vpop.f32.mrb[10].mxu1  ;;  %2809 = vmatpush3.bf16.msra.mxu0 %v2806_v38 }
  0xf4   :  { %2799 = vmatpush3.bf16.xpose.msk.msra.mxu1 %vm3256_vm2, %v2794_v46  ;;  %v322_v54 = vpop.f32.mrb[11].mxu1 }
  0xf5   :  { %2802 = vmatprep.subr.msk.bf16.mxu1 %vm3256_vm2, %v2800_v49  ;;  %v2828_v55 = vpack.c.bf16 %v2461_v53, %v322_v54 }
  0xf7   :  { %v2464_v56 = vpop.f32.mrb[12].mxu1 }
  0xf8   :  { %v332_v57 = vpop.f32.mrb[13].mxu1 }
  0xf9   :  { %v2834_v58 = vpack.c.bf16 %v2464_v56, %v332_v57 }
  0xfb   :  { %v2467_v59 = vpop.f32.mrb[14].mxu1 }
  0xfc   :  { %2805 = vmatpush3.bf16.xpose.msk.msra.mxu1 %vm3256_vm2, %v2800_v49  ;;  %v342_v60 = vpop.f32.mrb[15].mxu1  ;;  %v2481_v49 = vpop.f32.mrb[6].mxu0 }
  0xfd   :  { %2824 = vmatprep.subr.msk.bf16.mxu1 %vm3256_vm2, %v2822_v52  ;;  %v2840_v61 = vpack.c.bf16 %v2467_v59, %v342_v60  ;;  %v431_v51 = vpop.f32.mrb[7].mxu0 }
  0xfe   :  { %v2810_v53 = vpack.c.bf16 %v2481_v49, %v431_v51  ;;  %v2484_v56 = vpop.f32.mrb[8].mxu0  ;;  %v2150_v51 = vld [vmem:[%s3587_s2 + $0x38] sm:$0xff] }
 0x100   :  { %2811 = vmatprep.subr.bf16.mxu0 %v2810_v53 }
 0x101   :  { %2813 = vmatpush3.bf16.msra.mxu0 %v2810_v53 }
 0x103   :  { %2517 = vmatmul.mubr.msk.f32.vlgmr.msra.gmra.mrb[16].mxu1 %vm500_vm1, %v151_v62 }
 0x104   :  { %2827 = vmatpush3.bf16.xpose.msk.msra.mxu1 %vm3256_vm2, %v2822_v52  ;;  %2554 = vmatprep.mubr.msk.f32.mxu1 %vm500_vm1, %v152_v63 }
 0x105   :  { %2830 = vmatprep.subr.msk.bf16.mxu1 %vm3256_vm2, %v2828_v55 }
 0x10c   :  { %2833 = vmatpush3.bf16.xpose.msk.msra.mxu1 %vm3256_vm2, %v2828_v55 }
 0x10d   :  { %2836 = vmatprep.subr.msk.bf16.mxu1 %vm3256_vm2, %v2834_v58 }
 0x114   :  { %2839 = vmatpush3.bf16.xpose.msk.msra.mxu1 %vm3256_vm2, %v2834_v58  ;;  %v441_v58 = vpop.f32.mrb[9].mxu0 }
 0x115   :  { %2842 = vmatprep.subr.msk.bf16.mxu1 %vm3256_vm2, %v2840_v61  ;;  %v2814_v59 = vpack.c.bf16 %v2484_v56, %v441_v58  ;;  %v2156_v56 = vld [vmem:[%s3588_s3 + $0x28] sm:$0xff]  ;;  %v2157_v58 = vld [vmem:[%s3588_s3 + $0x30] sm:$0xff] }
 0x117   :  { %2815 = vmatprep.subr.bf16.mxu0 %v2814_v59 }
 0x118   :  { %2817 = vmatpush3.bf16.msra.mxu0 %v2814_v59  ;;  %v2158_v59 = vld [vmem:[%s3588_s3 + $0x38] sm:$0xff] }
 0x11c   :  { %2845 = vmatpush3.bf16.xpose.msk.msra.mxu1 %vm3256_vm2, %v2840_v61  ;;  %v2487_v61 = vpop.f32.mrb[10].mxu0 }
 0x11d   :  { %v451_v62 = vpop.f32.mrb[11].mxu0 }
 0x11e   :  { %v2818_v63 = vpack.c.bf16 %v2487_v61, %v451_v62  ;;  %v2490_v2 = vpop.f32.mrb[12].mxu0 }
 0x11f   :  { %v461_v3 = vpop.f32.mrb[13].mxu0 }
 0x120   :  { %2819 = vmatprep.subr.bf16.mxu0 %v2818_v63  ;;  %v2846_v4 = vpack.c.bf16 %v2490_v2, %v461_v3  ;;  %v2493_v6 = vpop.f32.mrb[14].mxu0 }
 0x121   :  { %2821 = vmatpush3.bf16.msra.mxu0 %v2818_v63 }
 0x122   :  { %2847 = vmatprep.subr.bf16.mxu0 %v2846_v4 }
 0x123   :  { %2555 = vmatmul.mubr.msk.f32.vlgmr.msra.gmra.mrb[18].mxu1 %vm500_vm1, %v153_v0 }
 0x124   :  { %2630 = vmatprep.mubr.msk.f32.mxu1 %vm52_vm0, %v3103_v5 }
 0x1d6   :  { %v2518_v8 = vpop.f32.mrb[16].mxu1 }
 0x1d7   :  { %v597_v9 = vpop.f32.mrb[17].mxu1  ;;  %v610_v11 = vsel %vm606_vm3, %v2518_v8, -inf }
 0x1d8   :  { %v607_v10 = vsel %vm606_vm3, %v597_v9, -inf }
 0x1d9   :  { %608 = vmax.xlane.f32.xlu0 %v607_v10 }
 0x1dd   :  { %611 = vmax.xlane.f32.xlu0 %v610_v11 }
 0x1f6   :  { %v2556_v13 = vpop.f32.mrb[18].mxu1 }
 0x1f7   :  { %v808_v32 = vpop.f32.mrb[19].mxu1  ;;  %v820_v35 = vsel %vm606_vm3, %v2556_v13, -inf }
 0x1f8   :  { %v817_v33 = vsel %vm606_vm3, %v808_v32, -inf }
 0x1f9   :  { %818 = vmax.xlane.f32.xlu1 %v817_v33 }
 0x1fd   :  { %821 = vmax.xlane.f32.xlu1 %v820_v35 }
 0x266   :  { %v609_v39 = vpop.xlane.xlu0 %608 }
 0x267   :  { %v613_v40 = vsub.f32 %v597_v9, %v609_v39 }
 0x269   :  { %v615_v41 = vmul.f32 1.442695, %v613_v40 }
 0x26a   :  { %v612_v42 = vpop.xlane.xlu0 %611 }
 0x26b   :  { %2989 = vpow2.f32 %v615_v41  ;;  %v614_v43 = vsub.f32 %v2518_v8, %v612_v42  ;;  %v471_v8 = vpop.f32.mrb[15].mxu0 }
 0x26c   :  { %v2850_v10 = vpack.c.bf16 %v2493_v6, %v471_v8  ;;  %v2496_v11 = vpop.f32.mrb[16].mxu0 }
 0x26d   :  { %v617_v44 = vmul.f32 1.442695, %v614_v43  ;;  %v2147_v43 = vld [vmem:[%s3587_s2 + $0x20] sm:$0xff] }
 0x26f   :  { %2991 = vpow2.f32 %v617_v44  ;;  %v2148_v44 = vld [vmem:[%s3587_s2 + $0x28] sm:$0xff] }
 0x275   :  { %v2990_v45 = vpop.eup %2989 }
 0x276   :  { %v619_v46 = vsel %vm606_vm3, %v2990_v45, 0.0 }
 0x277   :  { %620 = vadd.xlane.f32.xlu0 %v619_v46 }
 0x279   :  { %v2992_v47 = vpop.eup %2991 }
 0x27a   :  { %v622_v48 = vsel %vm606_vm3, %v2992_v47, 0.0 }
 0x27b   :  { %623 = vadd.xlane.f32.xlu1 %v622_v48 }
 0x286   :  { %v819_v50 = vpop.xlane.xlu1 %818 }
 0x287   :  { %v823_v52 = vsub.f32 %v808_v32, %v819_v50  ;;  %v2149_v50 = vld [vmem:[%s3587_s2 + $0x30] sm:$0xff] }
 0x289   :  { %v825_v54 = vmul.f32 1.442695, %v823_v52 }
 0x28a   :  { %v822_v55 = vpop.xlane.xlu1 %821 }
 0x28b   :  { %2993 = vpow2.f32 %v825_v54  ;;  %v824_v57 = vsub.f32 %v2556_v13, %v822_v55  ;;  %v481_v13 = vpop.f32.mrb[17].mxu0  ;;  %v2866_v54 = vpack.c.bf16 %v2150_v51, %v2149_v50  ;;  %v2155_v55 = vld [vmem:[%s3588_s3 + $0x20] sm:$0xff] }
 0x28c   :  { %v2854_v32 = vpack.c.bf16 %v2496_v11, %v481_v13  ;;  %v2499_v33 = vpop.f32.mrb[18].mxu0 }
 0x28d   :  { %v827_v60 = vmul.f32 1.442695, %v824_v57  ;;  %v491_v35 = vpop.f32.mrb[19].mxu0  ;;  %v2870_v57 = vpack.c.bf16 %v2156_v56, %v2155_v55 }
 0x28e   :  { %v2858_v36 = vpack.c.bf16 %v2499_v33, %v491_v35 }
 0x28f   :  { %2995 = vpow2.f32 %v827_v60  ;;  %v2874_v60 = vpack.c.bf16 %v2158_v59, %v2157_v58 }
 0x295   :  { %v2994_v0 = vpop.eup %2993 }
 0x296   :  { %v829_v1 = vsel %vm606_vm3, %v2994_v0, 0.0 }
 0x297   :  { %830 = vadd.xlane.f32.xlu0 %v829_v1 }
 0x299   :  { %v2996_v7 = vpop.eup %2995 }
 0x29a   :  { %v832_v9 = vsel %vm606_vm3, %v2996_v7, 0.0 }
 0x29b   :  { %833 = vadd.xlane.f32.xlu1 %v832_v9 }
 0x304   :  { %v621_v37 = vpop.xlane.xlu0 %620 }
 0x305   :  { %2997 = vrcp.f32 %v621_v37 }
 0x308   :  { %v624_v38 = vpop.xlane.xlu1 %623 }
 0x309   :  { %2999 = vrcp.f32 %v624_v38 }
 0x30f   :  { %v2998_v39 = vpop.eup %2997 }
 0x310   :  { %v626_v40 = vmul.f32 %v2998_v39, %v2990_v45  ;;  %v2862_v45 = vpack.c.bf16 %v2148_v44, %v2147_v43 }
 0x312   :  { %2535 = vmatprep.mubr.msk.f32.mxu0 %vm606_vm3, %v626_v40 }
 0x313   :  { %v3000_v41 = vpop.eup %2999 }
 0x314   :  { %v628_v42 = vmul.f32 %v3000_v41, %v2992_v47 }
 0x316   :  { %2536 = vmatmul.mubr.msk.f32.vlgmr.msra.gmra.mrb[20].mxu0 %vm606_vm3, %v628_v42 }
 0x317   :  { %2849 = vmatpush3.bf16.msra.mxu0 %v2846_v4 }
 0x318   :  { %2851 = vmatprep.subr.bf16.mxu0 %v2850_v10 }
 0x31b   :  { %2853 = vmatpush3.bf16.msra.mxu0 %v2850_v10 }
 0x31c   :  { %2855 = vmatprep.subr.bf16.mxu0 %v2854_v32 }
 0x31f   :  { %2857 = vmatpush3.bf16.msra.mxu0 %v2854_v32 }
 0x320   :  { %2859 = vmatprep.subr.bf16.mxu0 %v2858_v36 }
 0x323   :  { %2861 = vmatpush3.bf16.msra.mxu0 %v2858_v36 }
 0x324   :  { %v831_v46 = vpop.xlane.xlu0 %830  ;;  %2863 = vmatprep.subr.bf16.mxu0 %v2862_v45 }
 0x325   :  { %3001 = vrcp.f32 %v831_v46 }
 0x328   :  { %v834_v47 = vpop.xlane.xlu1 %833 }
 0x329   :  { %3003 = vrcp.f32 %v834_v47 }
 0x32f   :  { %v3002_v48 = vpop.eup %3001 }
 0x330   :  { %v836_v49 = vmul.f32 %v3002_v48, %v2994_v0 }
 0x332   :  { %2573 = vmatprep.mubr.msk.f32.mxu0 %vm606_vm3, %v836_v49 }
 0x333   :  { %v3004_v52 = vpop.eup %3003 }
 0x334   :  { %v838_v53 = vmul.f32 %v3004_v52, %v2996_v7 }
 0x336   :  { %2574 = vmatmul.mubr.msk.f32.vlgmr.msra.gmra.mrb[22].mxu0 %vm606_vm3, %v838_v53 }
 0x337   :  { %2865 = vmatpush3.bf16.msra.mxu0 %v2862_v45  ;;  %2584 = vmatprep.mubr.msk.f32.mxu0 %vm52_vm0, %v3122_v12  ;;  %v2176_v12 = vld [vmem:[%s3589_s4 + $0x28] sm:$0xff] }
 0x338   :  { %2867 = vmatprep.subr.bf16.mxu0 %v2866_v54 }
 0x33b   :  { %2869 = vmatpush3.bf16.msra.mxu0 %v2866_v54 }
 0x33c   :  { %2871 = vmatprep.subr.bf16.mxu0 %v2870_v57 }
 0x33e   :  { %2585 = vmatmul.mubr.msk.f32.vlgmr.msra.gmra.mrb[24].mxu0 %vm52_vm0, %v3148_v17 }
 0x33f   :  { %2873 = vmatpush3.bf16.msra.mxu0 %v2870_v57  ;;  %2587 = vmatprep.mubr.msk.f32.mxu0 %vm52_vm0, %v3158_v19  ;;  %v2177_v19 = vld [vmem:[%s3589_s4 + $0x30] sm:$0xff] }
 0x340   :  { %2875 = vmatprep.subr.bf16.mxu0 %v2874_v60 }
 0x342   :  { %2588 = vmatmul.mubr.msk.f32.gmra.mrb[26].mxu0 %vm52_vm0, %v3176_v21  ;;  %v2178_v21 = vld [vmem:[%s3589_s4 + $0x38] sm:$0xff] }
 0x343   :  { %2877 = vmatpush3.bf16.msra.mxu0 %v2874_v60  ;;  %2598 = vmatprep.mubr.msk.f32.mxu0 %vm52_vm0, %v3103_v5  ;;  %v2175_v5 = vld [vmem:[%s3589_s4 + $0x20] sm:$0xff]  ;;  %v2882_v61 = vpack.c.bf16 %v2178_v21, %v2177_v19  ;;  %v2207_v21 = vld [vmem:[%s3590_s5 + $0x10] sm:$0xff] }
 0x344   :  { %v2878_v17 = vpack.c.bf16 %v2176_v12, %v2175_v5 }
 0x346   :  { %2599 = vmatmul.mubr.msk.f32.vlgmr.msra.gmra.mrb[28].mxu0 %vm52_vm0, %v3129_v14  ;;  %2879 = vmatprep.subr.bf16.mxu1 %v2878_v17 }
 0x347   :  { %2601 = vmatprep.mubr.msk.f32.mxu0 %vm52_vm0, %v3134_v15  ;;  %2881 = vmatpush3.bf16.msra.mxu1 %v2878_v17 }
 0x348   :  { %2883 = vmatprep.subr.bf16.mxu1 %v2882_v61 }
 0x34a   :  { %2602 = vmatmul.mubr.msk.f32.gmra.mrb[30].mxu0 %vm52_vm0, %v3143_v16 }
 0x34b   :  { %2604 = vmatprep.mubr.msk.f32.mxu0 %vm52_vm0, %v3153_v18  ;;  %2885 = vmatpush3.bf16.msra.mxu1 %v2882_v61  ;;  %v2208_v61 = vld [vmem:[%s3590_s5 + $0x18] sm:$0xff] }
 0x34e   :  { %2605 = vmatmul.mubr.msk.f32.gmra.mrb[32].mxu0 %vm52_vm0, %v3169_v20  ;;  %2631 = vmatmul.mubr.msk.f32.vlgmr.msra.gmra.mrb[20].mxu1 %vm52_vm0, %v3129_v14 }
 0x34f   :  { %2607 = vmatprep.mubr.msk.f32.mxu0 %vm52_vm0, %v3181_v22  ;;  %2633 = vmatprep.mubr.msk.f32.mxu1 %vm52_vm0, %v3134_v15 }
 0x352   :  { %2608 = vmatmul.mubr.msk.f32.gmra.mrb[34].mxu0 %vm52_vm0, %v3192_v23  ;;  %2634 = vmatmul.mubr.msk.f32.gmra.mrb[22].mxu1 %vm52_vm0, %v3143_v16 }
 0x353   :  { %2610 = vmatprep.mubr.msk.f32.mxu0 %vm52_vm0, %v3199_v24  ;;  %2636 = vmatprep.mubr.msk.f32.mxu1 %vm52_vm0, %v3153_v18 }
 0x356   :  { %2611 = vmatmul.mubr.msk.f32.gmra.mrb[36].mxu0 %vm52_vm0, %v3208_v25  ;;  %2637 = vmatmul.mubr.msk.f32.gmra.mrb[24].mxu1 %vm52_vm0, %v3169_v20 }
 0x357   :  { %2613 = vmatprep.mubr.msk.f32.mxu0 %vm52_vm0, %v3213_v26  ;;  %2639 = vmatprep.mubr.msk.f32.mxu1 %vm52_vm0, %v3181_v22 }
 0x35a   :  { %2614 = vmatmul.mubr.msk.f32.gmra.mrb[38].mxu0 %vm52_vm0, %v3222_v27  ;;  %2640 = vmatmul.mubr.msk.f32.gmra.mrb[26].mxu1 %vm52_vm0, %v3192_v23 }
 0x35b   :  { %2616 = vmatprep.mubr.msk.f32.mxu0 %vm52_vm0, %v3227_v28  ;;  %2642 = vmatprep.mubr.msk.f32.mxu1 %vm52_vm0, %v3199_v24 }
 0x35e   :  { %2617 = vmatmul.mubr.msk.f32.gmra.mrb[40].mxu0 %vm52_vm0, %v3236_v29  ;;  %2643 = vmatmul.mubr.msk.f32.gmra.mrb[28].mxu1 %vm52_vm0, %v3208_v25 }
 0x35f   :  { %2619 = vmatprep.mubr.msk.f32.mxu0 %vm52_vm0, %v3241_v30  ;;  %2645 = vmatprep.mubr.msk.f32.mxu1 %vm52_vm0, %v3213_v26 }
 0x362   :  { %2620 = vmatmul.mubr.msk.f32.gmra.mrb[42].mxu0 %vm52_vm0, %v3250_v31  ;;  %2646 = vmatmul.mubr.msk.f32.gmra.mrb[30].mxu1 %vm52_vm0, %v3222_v27 }
 0x363   :  { %2648 = vmatprep.mubr.msk.f32.mxu1 %vm52_vm0, %v3227_v28 }
 0x366   :  { %2649 = vmatmul.mubr.msk.f32.gmra.mrb[32].mxu1 %vm52_vm0, %v3236_v29 }
 0x367   :  { %2651 = vmatprep.mubr.msk.f32.mxu1 %vm52_vm0, %v3241_v30 }
 0x36a   :  { %2652 = vmatmul.mubr.msk.f32.gmra.mrb[34].mxu1 %vm52_vm0, %v3250_v31 }
 0x3e9   :  { %v3458_v14 = vpop.f32.mrb[20].mxu0 }
 0x3ea   :  { %v3460_v15 = vpop.f32.mrb[21].mxu0 }
 0x409   :  { %v3462_v16 = vpop.f32.mrb[22].mxu0 }
 0x40a   :  { %v3464_v18 = vpop.f32.mrb[23].mxu0 }
 0x411   :  { %v2586_v20 = vpop.f32.mrb[24].mxu0 }
 0x412   :  { %v991_v22 = vpop.f32.mrb[25].mxu0  ;;  %v1011_v37 = vmul.f32 0.25, %v2586_v20 }
 0x413   :  { %v1010_v23 = vmul.f32 0.25, %v991_v22  ;;  %v3509_v22 = vpack.c.bf16 %v2208_v61, %v2207_v21 }
 0x415   :  { %v3466_v24 = vpop.f32.mrb[26].mxu0  ;;  %2670 = vmatprep.mubr.msk.f32.mxu0 %vm500_vm1, %v1010_v23 }
 0x416   :  { %v3469_v25 = vpop.f32.mrb[27].mxu0 }
 0x419   :  { %v2600_v26 = vpop.f32.mrb[28].mxu0 }
 0x41a   :  { %v1085_v27 = vpop.f32.mrb[29].mxu0 }
 0x41b   :  { %v2886_v28 = vpack.c.bf16 %v2600_v26, %v1085_v27 }
 0x41d   :  { %2888 = vmatprep.subr.msk.bf16.mxu0 %vm3256_vm2, %v2886_v28  ;;  %v2603_v29 = vpop.f32.mrb[30].mxu0 }
 0x41e   :  { %2891 = vmatpush3.bf16.xpose.msk.msra.mxu0 %vm3256_vm2, %v2886_v28  ;;  %v1095_v30 = vpop.f32.mrb[31].mxu0 }
 0x41f   :  { %v2892_v31 = vpack.c.bf16 %v2603_v29, %v1095_v30 }
 0x421   :  { %2894 = vmatprep.subr.msk.bf16.mxu0 %vm3256_vm2, %v2892_v31  ;;  %v2606_v62 = vpop.f32.mrb[32].mxu0  ;;  %v2632_v38 = vpop.f32.mrb[20].mxu1 }
 0x422   :  { %v1105_v63 = vpop.f32.mrb[33].mxu0  ;;  %v1235_v39 = vpop.f32.mrb[21].mxu1 }
 0x423   :  { %v2898_v0 = vpack.c.bf16 %v2606_v62, %v1105_v63  ;;  %v2910_v40 = vpack.c.bf16 %v2632_v38, %v1235_v39 }
 0x425   :  { %v2609_v1 = vpop.f32.mrb[34].mxu0  ;;  %v2635_v41 = vpop.f32.mrb[22].mxu1  ;;  %2911 = vmatprep.subr.bf16.mxu1 %v2910_v40 }
 0x426   :  { %2897 = vmatpush3.bf16.xpose.msk.msra.mxu0 %vm3256_vm2, %v2892_v31  ;;  %v1115_v2 = vpop.f32.mrb[35].mxu0  ;;  %v1245_v42 = vpop.f32.mrb[23].mxu1  ;;  %2913 = vmatpush3.bf16.msra.mxu1 %v2910_v40 }
 0x427   :  { %2900 = vmatprep.subr.msk.bf16.mxu0 %vm3256_vm2, %v2898_v0  ;;  %v2904_v3 = vpack.c.bf16 %v2609_v1, %v1115_v2  ;;  %v2914_v43 = vpack.c.bf16 %v2635_v41, %v1245_v42 }
 0x429   :  { %v2612_v4 = vpop.f32.mrb[36].mxu0  ;;  %v2638_v44 = vpop.f32.mrb[24].mxu1  ;;  %2915 = vmatprep.subr.bf16.mxu1 %v2914_v43 }
 0x42a   :  { %v1125_v6 = vpop.f32.mrb[37].mxu0  ;;  %v1255_v45 = vpop.f32.mrb[25].mxu1  ;;  %2917 = vmatpush3.bf16.msra.mxu1 %v2914_v43 }
 0x42b   :  { %v3481_v7 = vpack.c.bf16 %v2612_v4, %v1125_v6  ;;  %v2918_v46 = vpack.c.bf16 %v2638_v44, %v1255_v45  ;;  %v2229_v44 = vld [vmem:[%s3591_s6] ss:$0 sm:$0xff]  ;;  %s3045_s6 = smov [#allocation2]  }
 0x42c   :  { %s2076_s21 = sshll.u32 %s3045_s6, 4  ;;  %s2077_s21 = int_to_ptr.vmem [resolvable:$true] %s2076_s21 }
 0x42d   :  { %v2615_v8 = vpop.f32.mrb[38].mxu0  ;;  %v2641_v47 = vpop.f32.mrb[26].mxu1  ;;  %2919 = vmatprep.subr.bf16.mxu1 %v2918_v46  ;;  %s3021_s22 = scalar_lea.vmem %s2077_s21, 512  ;;  %p3026_p1 = scmp.lt.s32.totalorder %s2077_s21, %s2077_s21 }
 0x42e   :  { %2903 = vmatpush3.bf16.xpose.msk.msra.mxu0 %vm3256_vm2, %v2898_v0  ;;  %v1135_v9 = vpop.f32.mrb[39].mxu0  ;;  %v1265_v48 = vpop.f32.mrb[27].mxu1  ;;  %2921 = vmatpush3.bf16.msra.mxu1 %v2918_v46  ;;  %p3022_p0 = scmp.ne.s32.totalorder %s2077_s21, %s3021_s22  ;;  %p3027_p2 = scmp.lt.s32.totalorder %s3021_s22, %s3021_s22 }
 0x42f   :  { %2906 = vmatprep.subr.msk.bf16.mxu0 %vm3256_vm2, %v2904_v3  ;;  %v3487_v10 = vpack.c.bf16 %v2615_v8, %v1135_v9  ;;  %v2922_v49 = vpack.c.bf16 %v2641_v47, %v1265_v48  ;;  %v1012_v9 = vmul.f32 0.25, %v3469_v25  ;;  %v1013_v25 = vmul.f32 0.25, %v3466_v24 }
 0x430   :  { %p3028_p3 = por %p3027_p2, %p3026_p1 }
 0x431   :  { %v2618_v11 = vpop.f32.mrb[40].mxu0  ;;  %2923 = vmatprep.subr.bf16.mxu1 %v2922_v49  ;;  %v2644_v19 = vpop.f32.mrb[28].mxu1 }
 0x432   :  { %v1145_v13 = vpop.f32.mrb[41].mxu0  ;;  %2925 = vmatpush3.bf16.msra.mxu1 %v2922_v49  ;;  %v1275_v20 = vpop.f32.mrb[29].mxu1  ;;  %p3029_p4 = pnand %p3028_p3, %p3022_p0 }
 0x433   :  { %v3489_v32 = vpack.c.bf16 %v2618_v11, %v1145_v13  ;;  %2936 = vmatprep.subr.msk.bf16.mxu1 %vm3256_vm2, %v3481_v7  ;;  %v2958_v23 = vpack.c.bf16 %v2644_v19, %v1275_v20 }
 0x435   :  { %v2621_v33 = vpop.f32.mrb[42].mxu0  ;;  %v2647_v26 = vpop.f32.mrb[30].mxu1 }
 0x436   :  { %2909 = vmatpush3.bf16.xpose.msk.msra.mxu0 %vm3256_vm2, %v2904_v3  ;;  %v1155_v35 = vpop.f32.mrb[43].mxu0  ;;  %v1285_v27 = vpop.f32.mrb[31].mxu1 }
 0x437   :  { %v3493_v36 = vpack.c.bf16 %v2621_v33, %v1155_v35  ;;  %2927 = vmatprep.subr.bf16.mxu0 %v3509_v22  ;;  %v2962_v28 = vpack.c.bf16 %v2647_v26, %v1285_v27 }
 0x439   :  { %v2650_v29 = vpop.f32.mrb[32].mxu1 }
 0x43a   :  { %v1295_v30 = vpop.f32.mrb[33].mxu1 }
 0x43b   :  { %v2966_v31 = vpack.c.bf16 %v2650_v29, %v1295_v30 }
 0x43d   :  { %2671 = vmatmul.mubr.msk.f32.vlgmr.msra.gmra.mrb[44].mxu0 %vm500_vm1, %v1011_v37  ;;  %v2653_v62 = vpop.f32.mrb[34].mxu1 }
 0x43e   :  { %2929 = vmatpush3.bf16.msra.mxu0 %v3509_v22  ;;  %v1305_v63 = vpop.f32.mrb[35].mxu1 }
 0x43f   :  { %v2970_v0 = vpack.c.bf16 %v2653_v62, %v1305_v63 }
 0x510   :  { %v2672_v50 = vpop.f32.mrb[44].mxu0 }
 0x511   :  { %v1410_v51 = vpop.f32.mrb[45].mxu0  ;;  %v1422_v52 = vsel %vm606_vm3, %v2672_v50, -inf }
 0x512   :  { %1423 = vmax.xlane.f32.xlu1 %v1422_v52  ;;  %v1419_v53 = vsel %vm606_vm3, %v1410_v51, -inf }
 0x513   :  { %1420 = vmax.xlane.f32.xlu0 %v1419_v53 }
 0x59f   :  { %v1424_v54 = vpop.xlane.xlu1 %1423 }
 0x5a0   :  { %v1426_v55 = vsub.f32 %v2672_v50, %v1424_v54  ;;  %v1421_v56 = vpop.xlane.xlu0 %1420 }
 0x5a1   :  { %v1425_v57 = vsub.f32 %v1410_v51, %v1421_v56 }
 0x5a2   :  { %v1429_v58 = vmul.f32 1.442695, %v1426_v55 }
 0x5a3   :  { %v1427_v59 = vmul.f32 1.442695, %v1425_v57 }
 0x5a4   :  { %3005 = vpow2.f32 %v1429_v58 }
 0x5a5   :  { %3007 = vpow2.f32 %v1427_v59 }
 0x5ae   :  { %v3006_v60 = vpop.eup %3005 }
 0x5af   :  { %v3008_v5 = vpop.eup %3007  ;;  %v1434_v12 = vsel %vm606_vm3, %v3006_v60, 0.0 }
 0x5b0   :  { %1435 = vadd.xlane.f32.xlu1 %v1434_v12  ;;  %v1431_v17 = vsel %vm606_vm3, %v3008_v5, 0.0 }
 0x5b1   :  { %1432 = vadd.xlane.f32.xlu0 %v1431_v17 }
 0x63d   :  { %v1436_v1 = vpop.xlane.xlu1 %1435 }
 0x63e   :  { %3009 = vrcp.f32 %v1436_v1  ;;  %v1433_v2 = vpop.xlane.xlu0 %1432 }
 0x63f   :  { %3011 = vrcp.f32 %v1433_v2 }
 0x648   :  { %v3010_v3 = vpop.eup %3009 }
 0x649   :  { %v3012_v4 = vpop.eup %3011  ;;  %v1440_v8 = vmul.f32 %v3010_v3, %v3006_v60 }
 0x64a   :  { %v1438_v6 = vmul.f32 %v3012_v4, %v3008_v5 }
 0x64c   :  { %2689 = vmatprep.mubr.msk.f32.mxu1 %vm606_vm3, %v1438_v6 }
 0x64d   :  { %2690 = vmatmul.mubr.msk.f32.vlgmr.msra.gmra.mrb[36].mxu1 %vm606_vm3, %v1440_v8 }
 0x64e   :  { %2939 = vmatpush3.bf16.xpose.msk.msra.mxu1 %vm3256_vm2, %v3481_v7  ;;  %2722 = vmatprep.mubr.msk.f32.mxu1 %vm500_vm1, %v1012_v9  ;;  %v710_v7 = vld [vmem:[%s3590_s5] sm:$0xff] }
 0x64f   :  { %2942 = vmatprep.subr.msk.bf16.mxu1 %vm3256_vm2, %v3487_v10 }
 0x656   :  { %2945 = vmatpush3.bf16.xpose.msk.msra.mxu1 %vm3256_vm2, %v3487_v10  ;;  %v711_v10 = vld [vmem:[%s3590_s5 + $0x8] sm:$0xff] }
 0x657   :  { %2948 = vmatprep.subr.msk.bf16.mxu1 %vm3256_vm2, %v3489_v32  ;;  %v2930_v11 = vpack.c.bf16 %v711_v10, %v710_v7 }
 0x659   :  { %2931 = vmatprep.subr.bf16.mxu0 %v2930_v11 }
 0x65e   :  { %2951 = vmatpush3.bf16.xpose.msk.msra.mxu1 %vm3256_vm2, %v3489_v32 }
 0x65f   :  { %2954 = vmatprep.subr.msk.bf16.mxu1 %vm3256_vm2, %v3493_v36 }
 0x666   :  { %2957 = vmatpush3.bf16.xpose.msk.msra.mxu1 %vm3256_vm2, %v3493_v36 }
 0x66d   :  { %2723 = vmatmul.mubr.msk.f32.vlgmr.msra.gmra.mrb[38].mxu1 %vm500_vm1, %v1013_v25 }
 0x720   :  { %v2691_v13 = vpop.f32.mrb[36].mxu1 }
 0x721   :  { %v1513_v32 = vpop.f32.mrb[37].mxu1 }
 0x722   :  { %2696 = vmatprep.mubr.msk.f32.mxu0 %vm500_vm1, %v1513_v32 }
 0x723   :  { %2697 = vmatmul.mubr.msk.f32.vlgmr.msra.gmra.mrb[46].mxu0 %vm500_vm1, %v2691_v13 }
 0x724   :  { %2933 = vmatpush3.bf16.msra.mxu0 %v2930_v11  ;;  %2703 = vmatprep.mubr.msk.f32.mxu0 %vm500_vm1, %v3460_v15 }
 0x725   :  { %2959 = vmatprep.subr.bf16.mxu0 %v2958_v23 }
 0x72b   :  { %2704 = vmatmul.mubr.msk.f32.vlgmr.msra.gmra.mrb[46].mxu0 %vm500_vm1, %v3458_v14 }
 0x72c   :  { %2961 = vmatpush3.bf16.msra.mxu0 %v2958_v23 }
 0x72d   :  { %2963 = vmatprep.subr.bf16.mxu0 %v2962_v28 }
 0x730   :  { %2965 = vmatpush3.bf16.msra.mxu0 %v2962_v28 }
 0x731   :  { %2967 = vmatprep.subr.bf16.mxu0 %v2966_v31 }
 0x734   :  { %2969 = vmatpush3.bf16.msra.mxu0 %v2966_v31 }
 0x735   :  { %2971 = vmatprep.subr.bf16.mxu0 %v2970_v0 }
 0x738   :  { %2973 = vmatpush3.bf16.msra.mxu0 %v2970_v0 }
 0x739   :  { %2975 = vmatprep.subr.bf16.mxu0 %v3509_v22 }
 0x740   :  { %v2724_v34 = vpop.f32.mrb[38].mxu1 }
 0x741   :  { %v1783_v24 = vpop.f32.mrb[39].mxu1  ;;  %v1795_v33 = vsel %vm606_vm3, %v2724_v34, -inf }
 0x742   :  { %1796 = vmax.xlane.f32.xlu1 %v1795_v33  ;;  %v1792_v15 = vsel %vm606_vm3, %v1783_v24, -inf }
 0x743   :  { %1793 = vmax.xlane.f32.xlu0 %v1792_v15 }
 0x7cf   :  { %v1797_v35 = vpop.xlane.xlu1 %1796 }
 0x7d0   :  { %v1799_v36 = vsub.f32 %v2724_v34, %v1797_v35  ;;  %v1794_v14 = vpop.xlane.xlu0 %1793 }
 0x7d1   :  { %v1798_v37 = vsub.f32 %v1783_v24, %v1794_v14 }
 0x7d2   :  { %v1802_v38 = vmul.f32 1.442695, %v1799_v36 }
 0x7d3   :  { %v1800_v39 = vmul.f32 1.442695, %v1798_v37 }
 0x7d4   :  { %3013 = vpow2.f32 %v1802_v38 }
 0x7d5   :  { %3015 = vpow2.f32 %v1800_v39 }
 0x7de   :  { %v3014_v40 = vpop.eup %3013 }
 0x7df   :  { %v3016_v41 = vpop.eup %3015  ;;  %v1807_v42 = vsel %vm606_vm3, %v3014_v40, 0.0 }
 0x7e0   :  { %1808 = vadd.xlane.f32.xlu1 %v1807_v42  ;;  %v1804_v43 = vsel %vm606_vm3, %v3016_v41, 0.0 }
 0x7e1   :  { %1805 = vadd.xlane.f32.xlu0 %v1804_v43 }
 0x7fe   :  { %v2705_v45 = vpop.f32.mrb[46].mxu0 }
 0x7ff   :  { %v2064_v46 = vadd.f32 %v2705_v45, %v2229_v44  ;;  %v1678_v47 = vpop.f32.mrb[47].mxu0 }
 0x800   :  { %v2063_v48 = vadd.f32 %v2229_v44, %v1678_v47 }
 0x801   :  { %2066 = vst.msk [vmem:[#allocation2 + $0x8] sm:$0xff] %vm52_vm0, %v2064_v46 }
 0x802   :  { %2065 = vst.msk [vmem:[#allocation2] sm:$0xff] %vm52_vm0, %v2063_v48 }
 0x86d   :  { %v1809_v49 = vpop.xlane.xlu1 %1808 }
 0x86e   :  { %3017 = vrcp.f32 %v1809_v49  ;;  %v1806_v50 = vpop.xlane.xlu0 %1805 }
 0x86f   :  { %3019 = vrcp.f32 %v1806_v50 }
 0x878   :  { %v3018_v51 = vpop.eup %3017 }
 0x879   :  { %v3020_v52 = vpop.eup %3019  ;;  %v1813_v54 = vmul.f32 %v3018_v51, %v3014_v40 }
 0x87a   :  { %v1811_v53 = vmul.f32 %v3020_v52, %v3016_v41 }
 0x87c   :  { %2741 = vmatprep.mubr.msk.f32.mxu0 %vm606_vm3, %v1811_v53 }
 0x87d   :  { %2742 = vmatmul.mubr.msk.f32.vlgmr.msra.gmra.mrb[48].mxu0 %vm606_vm3, %v1813_v54 }
 0x87e   :  { %2977 = vmatpush3.bf16.msra.mxu0 %v3509_v22 }
 0x87f   :  { %2979 = vmatprep.subr.bf16.mxu0 %v2930_v11 }
 0x950   :  { %v2743_v55 = vpop.f32.mrb[48].mxu0 }
 0x951   :  { %v1886_v56 = vpop.f32.mrb[49].mxu0 }
 0x952   :  { %2748 = vmatprep.mubr.msk.f32.mxu0 %vm500_vm1, %v1886_v56 }
 0x953   :  { %2749 = vmatmul.mubr.msk.f32.vlgmr.msra.gmra.mrb[50].mxu0 %vm500_vm1, %v2743_v55 }
 0x954   :  { %2981 = vmatpush3.bf16.msra.mxu0 %v2930_v11  ;;  %2755 = vmatprep.mubr.msk.f32.mxu0 %vm500_vm1, %v3464_v18 }
 0x95b   :  { %2756 = vmatmul.mubr.msk.f32.vlgmr.msra.gmra.mrb[50].mxu0 %vm500_vm1, %v3462_v16 }
 0xa2e   :  { %v2757_v57 = vpop.f32.mrb[50].mxu0 }
 0xa2f   :  { %v2068_v58 = vadd.f32 %v2757_v57, %v2229_v44  ;;  %v2048_v59 = vpop.f32.mrb[51].mxu0 }
 0xa30   :  { %v2067_v60 = vadd.f32 %v2229_v44, %v2048_v59 }
 0xa31   :  { %2070 = vst.msk [vmem:[#allocation2 + $0x18] sm:$0xff] %vm52_vm0, %v2068_v58 }
 0xa32   :  { %2069 = vst.msk [vmem:[#allocation2 + $0x10] sm:$0xff] %vm52_vm0, %v2067_v60 }
 0xa33   :  { %3032 = shalt.err (!%p3029_p4)
}
 0xa34   :  { %s3033_s25 = scalar_lea.hbm %s3592_s7, 512 }
 0xa35   :  { %p3034_p5 = scmp.ne.s32.totalorder %s3592_s7, %s3033_s25  ;;  %p3037_p6 = scmp.lt.u32.totalorder %s3033_s25, %s3592_s7 }
 0xa37   :  { %p3039_p7 = pnand %p3037_p6, %p3034_p5 }
 0xa39   :  { %3042 = shalt.err (!%p3039_p7)
}
 0xa3a   :  { %s3046_s29 = smov 128   ;;  %s3047_s30 = smov 8  }
 0xa3b   :  { %2082 = dma.vmem_to_hbm [thread:$0]  %s2077_s21, 512, %s3592_s7, [#allocation3], %s3046_s29, %s3046_s29, %s3047_s30  }
 0xa3c   :  { %3043 = dma.done.wait [#allocation3], 512  }
 0xa3d   :  { %3044 = vsyncadd [#allocation3], 4294966784 }
 0xa3e   :  { %2086 = vsyncpa [#allocation3], 1 }

</bundles_post_ra>
